<compile_context>
chip_gen: v7x
topology: tpu7x:2x2x1
jax: 0.10.0
libtpu: 0.0.40
codegen_flags: <defaults>
</compile_context>

<pallas_src>
import functools
import math

import jax
import jax.numpy as jnp
from jax.experimental import pallas as pl
from jax.experimental.pallas import tpu as pltpu


def pick_head_block(num_heads, head_dim, target_lanes=256):
    """Smallest head-block whose lane width (HB*d) is a 128-multiple >= target;
    falls back to all heads (full hidden dim is lane-dense by definition)."""
    divisors = [hb for hb in range(1, num_heads + 1) if num_heads % hb == 0]
    aligned = [hb for hb in divisors if (hb * head_dim) % 128 == 0]
    if aligned:
        big_enough = [hb for hb in aligned if hb * head_dim >= target_lanes]
        return big_enough[0] if big_enough else aligned[-1]
    return num_heads


def vivit_attn_kernel(x_ref, w_ref, bq_ref, bv_ref, out_ref, *,
                      scale, head_dim, heads_per_block, key_chunk):
    # x_ref  : (1, S, H)          w_ref  : (1, H, 3*HB*d)  (bf16, [Q|K|V] head-major)
    # bq_ref : (1, 1, HB*d)       bv_ref : (1, 1, HB*d)
    # out_ref: (1, S, HB*d)  -- a lane-dense column slab of the merged (B,S,H) output
    d = head_dim
    HB = heads_per_block
    HBd = HB * d
    S = x_ref.shape[1]

    x = x_ref[0].astype(jnp.bfloat16)                       # (S, H)
    w = w_ref[0]                                            # (H, 3*HBd) bf16
    # Single wide QKV projection for the whole head block (MXU, f32 accumulation).
    qkv = jnp.dot(x, w, preferred_element_type=jnp.float32)  # (S, 3*HBd)

    # Add query bias and fold 1/sqrt(d) into Q once (cheaper than scaling scores).
    # Key bias is dropped (softmax invariant); value bias is folded in at the end.
    q_all = ((qkv[:, :HBd] + bq_ref[0]) * scale).astype(jnp.bfloat16)  # (S, HBd)

    for h in range(HB):                                     # static, small (<= HB)
        lo, hi = h * d, (h + 1) * d
        q_h = q_all[:, lo:hi]                               # (S, d) bf16

        m = None
        l = None
        acc = None
        for c0 in range(0, S, key_chunk):                   # static key chunks
            c1 = min(c0 + key_chunk, S)
            k_c = qkv[c0:c1, HBd + lo:HBd + hi].astype(jnp.bfloat16)      # (TK, d)
            v_c = qkv[c0:c1, 2 * HBd + lo:2 * HBd + hi].astype(jnp.bfloat16)

            # scores = q_h @ k_c^T  (scale already folded into q_h)
            s = jax.lax.dot_general(q_h, k_c, (((1,), (1,)), ((), ())),
                                    preferred_element_type=jnp.float32)   # (S, TK)
            m_c = jnp.max(s, axis=-1, keepdims=True)
            if m is None:
                m = m_c
                p = jnp.exp(s - m)                                        # f32
                l = jnp.sum(p, axis=-1, keepdims=True)
                acc = jnp.dot(p.astype(jnp.bfloat16), v_c,
                              preferred_element_type=jnp.float32)         # (S, d)
            else:
                m_new = jnp.maximum(m, m_c)
                alpha = jnp.exp(m - m_new)
                p = jnp.exp(s - m_new)
                l = alpha * l + jnp.sum(p, axis=-1, keepdims=True)
                acc = alpha * acc + jnp.dot(p.astype(jnp.bfloat16), v_c,
                                            preferred_element_type=jnp.float32)
                m = m_new

        # Deferred normalization (S*d divides instead of S*S) + value bias.
        inv_l = pl.reciprocal(l, approx=True)               # EUP slot, ~free
        ctx_h = acc * inv_l + bv_ref[0, :, lo:hi]           # (S, d) f32
        out_ref[0, :, lo:hi] = ctx_h.astype(out_ref.dtype)


def vivit_self_attention(hidden_states, wq, bq, wk, bk, wv, bv, num_heads):
    """hidden_states: (B, S, H) f32
       wq/wk/wv     : (H, H) PyTorch nn.Linear weights (out_features, in_features)
       bq/bk/bv     : (H,)
    returns context_layer (B, S, H)"""
    del bk  # softmax is invariant to the key bias; mathematically exact to drop it.
    B, S, H = hidden_states.shape
    d = H // num_heads
    scale = 1.0 / math.sqrt(d)

    HB = pick_head_block(num_heads, d)          # heads per grid step
    nHB = num_heads // HB
    HBd = HB * d
    key_chunk = S if S <= 512 else 512

    # Head-major per-head weight: (nH, H_in, d) with [h, :, i] == w[h*d + i, :].
    def head_major(w):
        return jnp.transpose(w.reshape(num_heads, d, H), (0, 2, 1))

    # Group heads into blocks: (nH, H, d) -> (nHB, H, HB*d), heads contiguous on lanes.
    def block_heads(wh):
        return (wh.reshape(nHB, HB, H, d)
                  .transpose(0, 2, 1, 3)
                  .reshape(nHB, H, HBd))

    w_cat = jnp.concatenate(
        [block_heads(head_major(w)) for w in (wq, wk, wv)],
        axis=-1).astype(jnp.bfloat16)                       # (nHB, H, 3*HBd)
    bq_b = bq.reshape(nHB, 1, HBd).astype(jnp.float32)
    bv_b = bv.reshape(nHB, 1, HBd).astype(jnp.float32)

    # Cost hint for XLA scheduling around the custom call.
    flops = 2 * B * 3 * S * H * H + 4 * B * num_heads * S * S * d
    cost = pl.CostEstimate(
        flops=flops,
        transcendentals=B * num_heads * S * S,
        bytes_accessed=(hidden_states.nbytes + w_cat.nbytes + bq_b.nbytes
                        + bv_b.nbytes + B * S * H * hidden_states.dtype.itemsize))

    # Rough per-step VMEM footprint; keep the scoped limit modest (v7x has 64 MiB).
    vmem_need = (2 * S * H * 4            # hidden block (double-buffered)
                 + 2 * H * 3 * HBd * 2    # weight block (bf16)
                 + 2 * S * HBd * 4        # output block
                 + S * 3 * HBd * 4        # qkv temporary
                 + 2 * S * key_chunk * 4  # score-chunk temporaries
                 + 4 * S * d * 4)         # per-head running m/l/acc
    vmem_limit = int(min(max(vmem_need * 3 // 2, 32 * 1024 * 1024),
                         64 * 1024 * 1024))

    kernel = functools.partial(vivit_attn_kernel, scale=scale, head_dim=d,
                               heads_per_block=HB, key_chunk=key_chunk)

    return pl.pallas_call(
        kernel,
        out_shape=jax.ShapeDtypeStruct((B, S, H), hidden_states.dtype),
        grid=(B, nHB),
        in_specs=[
            pl.BlockSpec((1, S, H), lambda b, g: (b, 0, 0)),        # hidden, resident over g
            pl.BlockSpec((1, H, 3 * HBd), lambda b, g: (g, 0, 0)),  # fused QKV weights
            pl.BlockSpec((1, 1, HBd), lambda b, g: (g, 0, 0)),      # query bias
            pl.BlockSpec((1, 1, HBd), lambda b, g: (g, 0, 0)),      # value bias
        ],
        out_specs=pl.BlockSpec((1, S, HBd), lambda b, g: (b, 0, g)),  # lane-dense slab
        compiler_params=pltpu.CompilerParams(
            dimension_semantics=("parallel", "parallel"),
            vmem_limit_bytes=vmem_limit,
        ),
        cost_estimate=cost,
    )(hidden_states, w_cat, bq_b, bv_b)


def reference(hidden_states, wq, bq, wk, bk, wv, bv, num_heads):
    """Pure-JAX f32 reference implementing the PyTorch semantics directly."""
    B, S, H = hidden_states.shape
    d = H // num_heads

    def linear(x, w, b):
        return x @ w.T + b

    def split_heads(x):
        return jnp.transpose(x.reshape(B, S, num_heads, d), (0, 2, 1, 3))

    q = split_heads(linear(hidden_states, wq, bq))
    k = split_heads(linear(hidden_states, wk, bk))
    v = split_heads(linear(hidden_states, wv, bv))
    scores = jnp.einsum("bhqd,bhkd->bhqk", q, k) / math.sqrt(d)
    probs = jax.nn.softmax(scores, axis=-1)
    ctx = jnp.einsum("bhqk,bhkd->bhqd", probs, v)
    return jnp.transpose(ctx, (0, 2, 1, 3)).reshape(B, S, H)


if __name__ == "__main__":
    # Small config consistent with the module: batch=2, seq=8, hidden=32, heads=4.
    B, S, H, NH = 2, 8, 32, 4

    key = jax.random.PRNGKey(0)
    k0, k1, k2, k3, k4, k5, k6 = jax.random.split(key, 7)
    hidden = jax.random.normal(k0, (B, S, H), dtype=jnp.float32)
    wq = 0.05 * jax.random.normal(k1, (H, H), dtype=jnp.float32)
    wk = 0.05 * jax.random.normal(k2, (H, H), dtype=jnp.float32)
    wv = 0.05 * jax.random.normal(k3, (H, H), dtype=jnp.float32)
    bq = 0.1 * jax.random.normal(k4, (H,), dtype=jnp.float32)
    bk = 0.1 * jax.random.normal(k5, (H,), dtype=jnp.float32)
    bv = 0.1 * jax.random.normal(k6, (H,), dtype=jnp.float32)

    out = vivit_self_attention(hidden, wq, bq, wk, bk, wv, bv, NH)
    out = jax.block_until_ready(out)

    ref = reference(hidden, wq, bq, wk, bk, wv, bv, NH)
    assert out.shape == (B, S, H), out.shape
    # bf16 matmul operands + approx reciprocal => relax tolerance vs the f32 reference.
    max_err = float(jnp.max(jnp.abs(out - ref)))
    assert jnp.allclose(out, ref, atol=1e-2, rtol=1e-2), max_err
    print("KERNEL_OK")
</pallas_src>

<mosaic_0001>
module attributes {stable_mosaic.version = 11 : i64} {
  func.func @vivit_attn_kernel(%arg0: i32, %arg1: i32, %arg2: memref<1x8x32xf32, #tpu.memory_space<vmem>>, %arg3: memref<1x32x96xbf16, #tpu.memory_space<vmem>>, %arg4: memref<1x1x32xf32, #tpu.memory_space<vmem>>, %arg5: memref<1x1x32xf32, #tpu.memory_space<vmem>>, %arg6: memref<1x8x32xf32, #tpu.memory_space<vmem>>) attributes {dimension_semantics = [#tpu.dimension_semantics<parallel>, #tpu.dimension_semantics<parallel>], iteration_bounds = array<i64: 2, 1>, scalar_prefetch = 0 : i64, scratch_operands = 0 : i64, tpu.core_type = #tpu.core_type<tc>, window_params = [{transform_indices = @transform_0, window_bounds = array<i64: 1, 8, 32>}, {transform_indices = @transform_1, window_bounds = array<i64: 1, 32, 96>}, {transform_indices = @transform_2, window_bounds = array<i64: 1, 1, 32>}, {transform_indices = @transform_3, window_bounds = array<i64: 1, 1, 32>}, {transform_indices = @transform_4, window_bounds = array<i64: 1, 8, 32>}]} {
    %c0 = arith.constant 0 : index
    %c0_0 = arith.constant 0 : index
    %c0_1 = arith.constant 0 : index
    %0 = vector.load %arg2[%c0, %c0_0, %c0_1] : memref<1x8x32xf32, #tpu.memory_space<vmem>>, vector<1x8x32xf32>
    %1 = vector.shape_cast %0 : vector<1x8x32xf32> to vector<8x32xf32>
    %2 = arith.truncf %1 : vector<8x32xf32> to vector<8x32xbf16>
    %c0_2 = arith.constant 0 : index
    %c0_3 = arith.constant 0 : index
    %c0_4 = arith.constant 0 : index
    %3 = vector.load %arg3[%c0_2, %c0_3, %c0_4] : memref<1x32x96xbf16, #tpu.memory_space<vmem>>, vector<1x32x96xbf16>
    %4 = vector.shape_cast %3 : vector<1x32x96xbf16> to vector<32x96xbf16>
    %cst = arith.constant dense<0.000000e+00> : vector<8x96xf32>
    %5 = tpu.matmul %2, %4, %cst {dimension_numbers = #tpu.dot_dimension_numbers<[1], [0], [0], [1], [0, 0, 1, 1], [], []>} : vector<8x32xbf16>, vector<32x96xbf16>, vector<8x96xf32> -> vector<8x96xf32>
    %6 = vector.extract_strided_slice %5 {offsets = [0, 0], sizes = [8, 32], strides = [1, 1]} : vector<8x96xf32> to vector<8x32xf32>
    %c0_5 = arith.constant 0 : index
    %c0_6 = arith.constant 0 : index
    %c0_7 = arith.constant 0 : index
    %7 = vector.load %arg4[%c0_5, %c0_6, %c0_7] : memref<1x1x32xf32, #tpu.memory_space<vmem>>, vector<1x1x32xf32>
    %8 = vector.shape_cast %7 : vector<1x1x32xf32> to vector<1x32xf32>
    %9 = vector.broadcast %8 : vector<1x32xf32> to vector<8x32xf32>
    %10 = arith.addf %6, %9 : vector<8x32xf32>
    %cst_8 = arith.constant 0.353553385 : f32
    %11 = vector.broadcast %cst_8 : f32 to vector<8x32xf32>
    %12 = arith.mulf %10, %11 : vector<8x32xf32>
    %13 = arith.truncf %12 : vector<8x32xf32> to vector<8x32xbf16>
    %14 = vector.extract_strided_slice %13 {offsets = [0, 0], sizes = [8, 8], strides = [1, 1]} : vector<8x32xbf16> to vector<8x8xbf16>
    %15 = vector.extract_strided_slice %5 {offsets = [0, 32], sizes = [8, 8], strides = [1, 1]} : vector<8x96xf32> to vector<8x8xf32>
    %16 = arith.truncf %15 : vector<8x8xf32> to vector<8x8xbf16>
    %17 = vector.extract_strided_slice %5 {offsets = [0, 64], sizes = [8, 8], strides = [1, 1]} : vector<8x96xf32> to vector<8x8xf32>
    %18 = arith.truncf %17 : vector<8x8xf32> to vector<8x8xbf16>
    %cst_9 = arith.constant dense<0.000000e+00> : vector<8x8xf32>
    %19 = tpu.matmul %14, %16, %cst_9 {dimension_numbers = #tpu.dot_dimension_numbers<[1], [1], [0], [0], [0, 0, 1, 0], [], []>} : vector<8x8xbf16>, vector<8x8xbf16>, vector<8x8xf32> -> vector<8x8xf32>
    %cst_10 = arith.constant dense<0xFF800000> : vector<8xf32>
    %20 = vector.multi_reduction <maximumf>, %19, %cst_10 [1] : vector<8x8xf32> to vector<8xf32>
    %21 = vector.shape_cast %20 : vector<8xf32> to vector<8x1xf32>
    %22 = vector.broadcast %21 : vector<8x1xf32> to vector<8x8xf32>
    %23 = arith.subf %19, %22 : vector<8x8xf32>
    %24 = math.exp %23 : vector<8x8xf32>
    %cst_11 = arith.constant dense<0.000000e+00> : vector<8xf32>
    %25 = vector.multi_reduction <add>, %24, %cst_11 [1] : vector<8x8xf32> to vector<8xf32>
    %26 = vector.shape_cast %25 : vector<8xf32> to vector<8x1xf32>
    %27 = arith.truncf %24 : vector<8x8xf32> to vector<8x8xbf16>
    %cst_12 = arith.constant dense<0.000000e+00> : vector<8x8xf32>
    %28 = tpu.matmul %27, %18, %cst_12 {dimension_numbers = #tpu.dot_dimension_numbers<[1], [0], [0], [1], [0, 0, 1, 1], [], []>} : vector<8x8xbf16>, vector<8x8xbf16>, vector<8x8xf32> -> vector<8x8xf32>
    %29 = tpu.reciprocal %26 {approx = true} : vector<8x1xf32> -> vector<8x1xf32>
    %30 = vector.broadcast %29 : vector<8x1xf32> to vector<8x8xf32>
    %31 = arith.mulf %28, %30 : vector<8x8xf32>
    %c0_13 = arith.constant 0 : index
    %c0_14 = arith.constant 0 : index
    %c0_15 = arith.constant 0 : index
    %32 = vector.load %arg5[%c0_13, %c0_14, %c0_15] : memref<1x1x32xf32, #tpu.memory_space<vmem>>, vector<1x1x8xf32>
    %33 = vector.shape_cast %32 : vector<1x1x8xf32> to vector<1x8xf32>
    %34 = vector.broadcast %33 : vector<1x8xf32> to vector<8x8xf32>
    %35 = arith.addf %31, %34 : vector<8x8xf32>
    %c0_16 = arith.constant 0 : index
    %c0_17 = arith.constant 0 : index
    %c0_18 = arith.constant 0 : index
    %36 = vector.load %arg6[%c0_16, %c0_17, %c0_18] : memref<1x8x32xf32, #tpu.memory_space<vmem>>, vector<1x8x8xf32>
    %37 = vector.shape_cast %36 : vector<1x8x8xf32> to vector<8x8xf32>
    %38 = vector.shape_cast %35 : vector<8x8xf32> to vector<1x8x8xf32>
    tpu.vector_store %arg6[%c0_16, %c0_17, %c0_18], %38 {strides = array<i32>} : memref<1x8x32xf32, #tpu.memory_space<vmem>>, vector<1x8x8xf32>,
    %39 = vector.extract_strided_slice %13 {offsets = [0, 8], sizes = [8, 8], strides = [1, 1]} : vector<8x32xbf16> to vector<8x8xbf16>
    %40 = vector.extract_strided_slice %5 {offsets = [0, 40], sizes = [8, 8], strides = [1, 1]} : vector<8x96xf32> to vector<8x8xf32>
    %41 = arith.truncf %40 : vector<8x8xf32> to vector<8x8xbf16>
    %42 = vector.extract_strided_slice %5 {offsets = [0, 72], sizes = [8, 8], strides = [1, 1]} : vector<8x96xf32> to vector<8x8xf32>
    %43 = arith.truncf %42 : vector<8x8xf32> to vector<8x8xbf16>
    %cst_19 = arith.constant dense<0.000000e+00> : vector<8x8xf32>
    %44 = tpu.matmul %39, %41, %cst_19 {dimension_numbers = #tpu.dot_dimension_numbers<[1], [1], [0], [0], [0, 0, 1, 0], [], []>} : vector<8x8xbf16>, vector<8x8xbf16>, vector<8x8xf32> -> vector<8x8xf32>
    %cst_20 = arith.constant dense<0xFF800000> : vector<8xf32>
    %45 = vector.multi_reduction <maximumf>, %44, %cst_20 [1] : vector<8x8xf32> to vector<8xf32>
    %46 = vector.shape_cast %45 : vector<8xf32> to vector<8x1xf32>
    %47 = vector.broadcast %46 : vector<8x1xf32> to vector<8x8xf32>
    %48 = arith.subf %44, %47 : vector<8x8xf32>
    %49 = math.exp %48 : vector<8x8xf32>
    %cst_21 = arith.constant dense<0.000000e+00> : vector<8xf32>
    %50 = vector.multi_reduction <add>, %49, %cst_21 [1] : vector<8x8xf32> to vector<8xf32>
    %51 = vector.shape_cast %50 : vector<8xf32> to vector<8x1xf32>
    %52 = arith.truncf %49 : vector<8x8xf32> to vector<8x8xbf16>
    %cst_22 = arith.constant dense<0.000000e+00> : vector<8x8xf32>
    %53 = tpu.matmul %52, %43, %cst_22 {dimension_numbers = #tpu.dot_dimension_numbers<[1], [0], [0], [1], [0, 0, 1, 1], [], []>} : vector<8x8xbf16>, vector<8x8xbf16>, vector<8x8xf32> -> vector<8x8xf32>
    %54 = tpu.reciprocal %51 {approx = true} : vector<8x1xf32> -> vector<8x1xf32>
    %55 = vector.broadcast %54 : vector<8x1xf32> to vector<8x8xf32>
    %56 = arith.mulf %53, %55 : vector<8x8xf32>
    %c0_23 = arith.constant 0 : index
    %c0_24 = arith.constant 0 : index
    %c8 = arith.constant 8 : index
    %57 = vector.load %arg5[%c0_23, %c0_24, %c8] : memref<1x1x32xf32, #tpu.memory_space<vmem>>, vector<1x1x8xf32>
    %58 = vector.shape_cast %57 : vector<1x1x8xf32> to vector<1x8xf32>
    %59 = vector.broadcast %58 : vector<1x8xf32> to vector<8x8xf32>
    %60 = arith.addf %56, %59 : vector<8x8xf32>
    %c0_25 = arith.constant 0 : index
    %c0_26 = arith.constant 0 : index
    %c8_27 = arith.constant 8 : index
    %61 = vector.load %arg6[%c0_25, %c0_26, %c8_27] : memref<1x8x32xf32, #tpu.memory_space<vmem>>, vector<1x8x8xf32>
    %62 = vector.shape_cast %61 : vector<1x8x8xf32> to vector<8x8xf32>
    %63 = vector.shape_cast %60 : vector<8x8xf32> to vector<1x8x8xf32>
    tpu.vector_store %arg6[%c0_25, %c0_26, %c8_27], %63 {strides = array<i32>} : memref<1x8x32xf32, #tpu.memory_space<vmem>>, vector<1x8x8xf32>,
    %64 = vector.extract_strided_slice %13 {offsets = [0, 16], sizes = [8, 8], strides = [1, 1]} : vector<8x32xbf16> to vector<8x8xbf16>
    %65 = vector.extract_strided_slice %5 {offsets = [0, 48], sizes = [8, 8], strides = [1, 1]} : vector<8x96xf32> to vector<8x8xf32>
    %66 = arith.truncf %65 : vector<8x8xf32> to vector<8x8xbf16>
    %67 = vector.extract_strided_slice %5 {offsets = [0, 80], sizes = [8, 8], strides = [1, 1]} : vector<8x96xf32> to vector<8x8xf32>
    %68 = arith.truncf %67 : vector<8x8xf32> to vector<8x8xbf16>
    %cst_28 = arith.constant dense<0.000000e+00> : vector<8x8xf32>
    %69 = tpu.matmul %64, %66, %cst_28 {dimension_numbers = #tpu.dot_dimension_numbers<[1], [1], [0], [0], [0, 0, 1, 0], [], []>} : vector<8x8xbf16>, vector<8x8xbf16>, vector<8x8xf32> -> vector<8x8xf32>
    %cst_29 = arith.constant dense<0xFF800000> : vector<8xf32>
    %70 = vector.multi_reduction <maximumf>, %69, %cst_29 [1] : vector<8x8xf32> to vector<8xf32>
    %71 = vector.shape_cast %70 : vector<8xf32> to vector<8x1xf32>
    %72 = vector.broadcast %71 : vector<8x1xf32> to vector<8x8xf32>
    %73 = arith.subf %69, %72 : vector<8x8xf32>
    %74 = math.exp %73 : vector<8x8xf32>
    %cst_30 = arith.constant dense<0.000000e+00> : vector<8xf32>
    %75 = vector.multi_reduction <add>, %74, %cst_30 [1] : vector<8x8xf32> to vector<8xf32>
    %76 = vector.shape_cast %75 : vector<8xf32> to vector<8x1xf32>
    %77 = arith.truncf %74 : vector<8x8xf32> to vector<8x8xbf16>
    %cst_31 = arith.constant dense<0.000000e+00> : vector<8x8xf32>
    %78 = tpu.matmul %77, %68, %cst_31 {dimension_numbers = #tpu.dot_dimension_numbers<[1], [0], [0], [1], [0, 0, 1, 1], [], []>} : vector<8x8xbf16>, vector<8x8xbf16>, vector<8x8xf32> -> vector<8x8xf32>
    %79 = tpu.reciprocal %76 {approx = true} : vector<8x1xf32> -> vector<8x1xf32>
    %80 = vector.broadcast %79 : vector<8x1xf32> to vector<8x8xf32>
    %81 = arith.mulf %78, %80 : vector<8x8xf32>
    %c0_32 = arith.constant 0 : index
    %c0_33 = arith.constant 0 : index
    %c16 = arith.constant 16 : index
    %82 = vector.load %arg5[%c0_32, %c0_33, %c16] : memref<1x1x32xf32, #tpu.memory_space<vmem>>, vector<1x1x8xf32>
    %83 = vector.shape_cast %82 : vector<1x1x8xf32> to vector<1x8xf32>
    %84 = vector.broadcast %83 : vector<1x8xf32> to vector<8x8xf32>
    %85 = arith.addf %81, %84 : vector<8x8xf32>
    %c0_34 = arith.constant 0 : index
    %c0_35 = arith.constant 0 : index
    %c16_36 = arith.constant 16 : index
    %86 = vector.load %arg6[%c0_34, %c0_35, %c16_36] : memref<1x8x32xf32, #tpu.memory_space<vmem>>, vector<1x8x8xf32>
    %87 = vector.shape_cast %86 : vector<1x8x8xf32> to vector<8x8xf32>
    %88 = vector.shape_cast %85 : vector<8x8xf32> to vector<1x8x8xf32>
    tpu.vector_store %arg6[%c0_34, %c0_35, %c16_36], %88 {strides = array<i32>} : memref<1x8x32xf32, #tpu.memory_space<vmem>>, vector<1x8x8xf32>,
    %89 = vector.extract_strided_slice %13 {offsets = [0, 24], sizes = [8, 8], strides = [1, 1]} : vector<8x32xbf16> to vector<8x8xbf16>
    %90 = vector.extract_strided_slice %5 {offsets = [0, 56], sizes = [8, 8], strides = [1, 1]} : vector<8x96xf32> to vector<8x8xf32>
    %91 = arith.truncf %90 : vector<8x8xf32> to vector<8x8xbf16>
    %92 = vector.extract_strided_slice %5 {offsets = [0, 88], sizes = [8, 8], strides = [1, 1]} : vector<8x96xf32> to vector<8x8xf32>
    %93 = arith.truncf %92 : vector<8x8xf32> to vector<8x8xbf16>
    %cst_37 = arith.constant dense<0.000000e+00> : vector<8x8xf32>
    %94 = tpu.matmul %89, %91, %cst_37 {dimension_numbers = #tpu.dot_dimension_numbers<[1], [1], [0], [0], [0, 0, 1, 0], [], []>} : vector<8x8xbf16>, vector<8x8xbf16>, vector<8x8xf32> -> vector<8x8xf32>
    %cst_38 = arith.constant dense<0xFF800000> : vector<8xf32>
    %95 = vector.multi_reduction <maximumf>, %94, %cst_38 [1] : vector<8x8xf32> to vector<8xf32>
    %96 = vector.shape_cast %95 : vector<8xf32> to vector<8x1xf32>
    %97 = vector.broadcast %96 : vector<8x1xf32> to vector<8x8xf32>
    %98 = arith.subf %94, %97 : vector<8x8xf32>
    %99 = math.exp %98 : vector<8x8xf32>
    %cst_39 = arith.constant dense<0.000000e+00> : vector<8xf32>
    %100 = vector.multi_reduction <add>, %99, %cst_39 [1] : vector<8x8xf32> to vector<8xf32>
    %101 = vector.shape_cast %100 : vector<8xf32> to vector<8x1xf32>
    %102 = arith.truncf %99 : vector<8x8xf32> to vector<8x8xbf16>
    %cst_40 = arith.constant dense<0.000000e+00> : vector<8x8xf32>
    %103 = tpu.matmul %102, %93, %cst_40 {dimension_numbers = #tpu.dot_dimension_numbers<[1], [0], [0], [1], [0, 0, 1, 1], [], []>} : vector<8x8xbf16>, vector<8x8xbf16>, vector<8x8xf32> -> vector<8x8xf32>
    %104 = tpu.reciprocal %101 {approx = true} : vector<8x1xf32> -> vector<8x1xf32>
    %105 = vector.broadcast %104 : vector<8x1xf32> to vector<8x8xf32>
    %106 = arith.mulf %103, %105 : vector<8x8xf32>
    %c0_41 = arith.constant 0 : index
    %c0_42 = arith.constant 0 : index
    %c24 = arith.constant 24 : index
    %107 = vector.load %arg5[%c0_41, %c0_42, %c24] : memref<1x1x32xf32, #tpu.memory_space<vmem>>, vector<1x1x8xf32>
    %108 = vector.shape_cast %107 : vector<1x1x8xf32> to vector<1x8xf32>
    %109 = vector.broadcast %108 : vector<1x8xf32> to vector<8x8xf32>
    %110 = arith.addf %106, %109 : vector<8x8xf32>
    %c0_43 = arith.constant 0 : index
    %c0_44 = arith.constant 0 : index
    %c24_45 = arith.constant 24 : index
    %111 = vector.load %arg6[%c0_43, %c0_44, %c24_45] : memref<1x8x32xf32, #tpu.memory_space<vmem>>, vector<1x8x8xf32>
    %112 = vector.shape_cast %111 : vector<1x8x8xf32> to vector<8x8xf32>
    %113 = vector.shape_cast %110 : vector<8x8xf32> to vector<1x8x8xf32>
    tpu.vector_store %arg6[%c0_43, %c0_44, %c24_45], %113 {strides = array<i32>} : memref<1x8x32xf32, #tpu.memory_space<vmem>>, vector<1x8x8xf32>,
    return
  }
  func.func @transform_0(%arg0: i32, %arg1: i32) -> (i32, i32, i32) {
    %c0_i32 = arith.constant 0 : i32
    %c0_i32_0 = arith.constant 0 : i32
    %c0_i32_1 = arith.constant 0 : i32
    return %arg0, %c0_i32, %c0_i32_0 : i32, i32, i32
  }
  func.func @transform_1(%arg0: i32, %arg1: i32) -> (i32, i32, i32) {
    %c0_i32 = arith.constant 0 : i32
    %c0_i32_0 = arith.constant 0 : i32
    %c0_i32_1 = arith.constant 0 : i32
    return %arg1, %c0_i32, %c0_i32_0 : i32, i32, i32
  }
  func.func @transform_2(%arg0: i32, %arg1: i32) -> (i32, i32, i32) {
    %c0_i32 = arith.constant 0 : i32
    %c0_i32_0 = arith.constant 0 : i32
    %c0_i32_1 = arith.constant 0 : i32
    return %arg1, %c0_i32, %c0_i32_0 : i32, i32, i32
  }
  func.func @transform_3(%arg0: i32, %arg1: i32) -> (i32, i32, i32) {
    %c0_i32 = arith.constant 0 : i32
    %c0_i32_0 = arith.constant 0 : i32
    %c0_i32_1 = arith.constant 0 : i32
    return %arg1, %c0_i32, %c0_i32_0 : i32, i32, i32
  }
  func.func @transform_4(%arg0: i32, %arg1: i32) -> (i32, i32, i32) {
    %c0_i32 = arith.constant 0 : i32
    %c0_i32_0 = arith.constant 0 : i32
    return %arg0, %c0_i32, %arg1 : i32, i32, i32
  }
}

</mosaic_0001>

<bundles_post_ra>
// kernel: tpu_custom_call.1
= control target key start
LH: loop header
LB: loop body
LE: loop exit
PB: predicated region body
PF: predicated region fallthrough
CT: control target
= control target key end

     0   :  { %9 = vsyncpa [#allocation3], 0  ;;  %s1696_s0 = inlined_call_operand.hbm [shape: f32[2,8,32], index: 0, kind: input, shape index: {}]   ;;  %s1697_s1 = inlined_call_operand.hbm [shape: bf16[1,32,96], index: 1, kind: input, shape index: {}]   ;;  %s1698_s2 = inlined_call_operand.vmem [shape: f32[1,1,32], index: 2, kind: input, shape index: {}]   ;;  %s1699_s3 = inlined_call_operand.vmem [shape: f32[1,1,32], index: 3, kind: input, shape index: {}]   ;;  %s1700_s4 = inlined_call_operand.hbm [shape: f32[2,8,32], index: 4, kind: output, shape index: {}]  }
   0x1   :  { %11 = vsyncpa [#allocation3 + $0x1], 0 }
   0x2   :  { %12 = vsyncpa [#allocation6], 0 }
   0x3   :  { %13 = vsyncpa [#allocation4], 0 }
   0x4   :  { %15 = vsyncpa [#allocation4 + $0x1], 0  ;;  %s1390_s15 = smov 0   ;;  %s1392_s16 = smov 0  }
   0x5   :  { %s1394_s17 = smov 0   ;;  %s1396_s18 = smov 0  }
   0x6   :  { %s1398_s19 = smov 0   ;;  %s1400_s20 = smov 0  }
   0x7 LB: > { %s981_s21 = sadd.s32 4294967295, %s1342_s20   ;;  %s982_s22 = sadd.s32 4294967294, %s1342_s20   ;;  %s1342_s20 = sphi %s1400_s20, %s21_s20   ;;  %s1338_s19 = sphi %s1398_s19, %s1724_s19   ;;  %s1334_s18 = sphi %s1396_s18, %s1723_s18   ;;  %s1330_s17 = sphi %s1394_s17, %s1722_s17   ;;  %s1326_s16 = sphi %s1392_s16, %s1721_s16   ;;  %s1322_s15 = sphi %s1390_s15, %s1720_s15  }
   0x8   : > { %p53_p0 = scmp.ne.s32.totalorder %s1326_s16, %s1322_s15  ;;  %p1424_p1 = scmp.eq.s32.totalorder %s981_s21, 0 }
   0x9   : > { %p1428_p2 = scmp.eq.s32.totalorder %s981_s21, 1  ;;  %p163_p3 = scmp.eq.s32.totalorder %s982_s22, 1 }
   0xa   : > { %s1705_s23 = scalar_select %p1424_p1, 1, 0 }
   0xb   : > { %s1706_s24 = scalar_select %p1428_p2, 1, 0 }
   0xc   : > { %p1434_p4 = por %p1424_p1, %p53_p0  ;;  %p983_p5 = scmp.ge.s32.totalorder %s1342_s20, 1 }
   0xd   : > { %p1439_p6 = por %p163_p3, %p53_p0  ;;  %p170_p7 = scmp.lt.s32.totalorder %s1342_s20, 3 }
   0xe   : > { %s1707_s25 = scalar_select %p1434_p4, 1, 0 }
   0xf   : > { %s1708_s26 = scalar_select %p1439_p6, 1, 0 }
  0x10   : > { %p1444_p8 = pnand %p983_p5, %p170_p7  ;;  %s1344_s28 = smov [#allocation5]  }
  0x11   : > { %s185_s29 = sshll.u32 %s1344_s28, 4  ;;  %s33_s5 = sadd.s32 1, %s1338_s19  ;;  %s186_s29 = int_to_ptr.vmem [resolvable:$true] %s185_s29 }
  0x12   : > { %s1709_s27 = scalar_select %p1444_p8, 1, 0 }
  0x13   : > { %p1097_p9 = pneg %p1444_p8  ;;  %s1198_s8 = scalar_lea.hbm %s1697_s1, 256 }
  0x14   : > { %p1199_p12 = scmp.ne.s32.totalorder %s1697_s1, %s1198_s8  ;;  %p1205_p5 = scmp.lt.u32.totalorder %s1198_s8, %s1697_s1 }
  0x15   : > { %p1453_p11 = pnand %p1097_p9, %p1424_p1 }
  0x17   : > { %p1200_p13 = pneg %p1453_p11 }
  0x19   : > { %p1201_p0 = pnand %p1200_p13, %p1199_p12 }
  0x1b   : > { %p1202_p3 = pneg %p1201_p0 }
  0x1d   : > { %p1207_p7 = pnand %p1205_p5, %p1202_p3 }
  0x1f   : > { %1210 = shalt.err (!%p1207_p7)
}
  0x20   : > { %s1211_s13 = scalar_lea.vmem %s186_s29, 256  ;;  %p1219_p1 = scmp.lt.s32.totalorder %s186_s29, %s186_s29 }
  0x21   : > { %p1212_p9 = scmp.ne.s32.totalorder %s186_s29, %s1211_s13  ;;  %p1220_p4 = scmp.lt.s32.totalorder %s1211_s13, %s1211_s13 }
  0x23   : > { %p1214_p10 = pnand %p1212_p9, %p1200_p13  ;;  %p1221_p8 = por %p1220_p4, %p1219_p1 }
  0x25   : > { %p1215_p6 = pneg %p1214_p10 }
  0x27   : > { %p1222_p2 = pnand %p1221_p8, %p1215_p6 }
  0x29   : > { %1225 = shalt.err (!%p1222_p2)
}
  0x2a   : > { %s1345_s14 = smov 64   ;;  %s1346_s21 = smov 4  }
  0x2b   : > { %1100 = dma.hbm_to_vmem [thread:$0]  (!%p1453_p11), %s1697_s1, 256, %s186_s29, [#allocation6], %s1345_s14, %s1345_s14, %s1346_s21  }
  0x2c   : > { %p35_p1 = scmp.ge.s32.totalorder %s33_s5, 2  ;;  %s40_s6 = sadd.s32 1, %s1330_s17 }
  0x2d   : > { %p47_p2 = scmp.ne.s32.totalorder %s1330_s17, %s1326_s16  ;;  %p48_p4 = scmp.eq.s32.totalorder %s1342_s20, 0 }
  0x2e   : > { %s1726_s5 = smov (%p35_p1, %s33_s5), 0  ;;  %p1712_p8 = scmp.ne.s32.totalorder %s1706_s24, 0 }
  0x2f   : > { %p1480_p6 = por %p48_p4, %p47_p2  ;;  %s37_s30 = ssub.s32 %s1338_s19, %s1726_s5 }
  0x30   : > { %p1486_p10 = por %p1712_p8, %p47_p2  ;;  %p1110_p12 = scmp.lt.s32.totalorder %s1342_s20, 2 }
  0x31   : > { %p38_p11 = scmp.eq.s32.totalorder %s37_s30, 0  ;;  %s211_s29 = sand.u32 1, %s1330_s17  }
  0x32   : > { %s988_s9 = sshll.u32 %s211_s29, 3  ;;  %s989_s11 = sshll.u32 %s1338_s19, 7 }
  0x33   : > { %s1495_s10 = scalar_select %p38_p11, %s1330_s17, %s40_s6  }
  0x34   : > { %s1501_s14 = scalar_lea.hbm %s1696_s0, %s989_s11  ;;  %s215_s24 = scalar_lea.vmem [#allocation2], %s988_s9 }
  0x35   : > { %s222_s21 = sshll.u32 %s215_s24, 4  ;;  %p1507_p13 = pnand %p1110_p12, %p1480_p6  ;;  %s1503_s21 = int_to_ptr.vmem [resolvable:$true] %s222_s21 }
  0x36   : > { %s212_s28 = scalar_lea.sflag [#allocation3], %s211_s29  ;;  %s1226_s6 = scalar_lea.hbm %s1501_s14, 128 }
  0x37   : > { %p1227_p0 = scmp.ne.s32.totalorder %s1501_s14, %s1226_s6  ;;  %p1228_p3 = pneg %p1507_p13 }
  0x38   : > { %s1231_s11 = scalar_lea.hbm %s1696_s0, 256  ;;  %p1232_p9 = scmp.lt.u32.totalorder %s1501_s14, %s1696_s0 }
  0x39   : > { %p1229_p5 = pnand %p1228_p3, %p1227_p0  ;;  %p1233_p1 = scmp.lt.u32.totalorder %s1231_s11, %s1226_s6 }
  0x3a   : > { %p1235_p4 = scmp.lt.u32.totalorder %s1226_s6, %s1501_s14 }
  0x3b   : > { %p1230_p7 = pneg %p1229_p5  ;;  %p1234_p2 = por %p1233_p1, %p1232_p9 }
  0x3d   : > { %p1236_p6 = por %p1235_p4, %p1234_p2 }
  0x3f   : > { %p1237_p8 = pnand %p1236_p6, %p1230_p7 }
  0x41   : > { %1240 = shalt.err (!%p1237_p8)
}
  0x42   : > { %s1241_s29 = scalar_lea.vmem %s1503_s21, 128  ;;  %s1347_s13 = smov [#allocation2]  }
  0x43   : > { %p1242_p12 = scmp.ne.s32.totalorder %s1503_s21, %s1241_s29  ;;  %s1246_s24 = sshll.u32 %s1347_s13, 4  ;;  %s1247_s24 = int_to_ptr.vmem [resolvable:$false] %s1246_s24 }
  0x44   : > { %s1248_s30 = scalar_lea.vmem %s1247_s24, 256  ;;  %p1249_p5 = scmp.lt.s32.totalorder %s1503_s21, %s1247_s24 }
  0x45   : > { %p1244_p11 = pnand %p1242_p12, %p1228_p3  ;;  %p1250_p9 = scmp.lt.s32.totalorder %s1248_s30, %s1241_s29 }
  0x47   : > { %p1245_p0 = pneg %p1244_p11  ;;  %p1251_p1 = por %p1250_p9, %p1249_p5 }
  0x49   : > { %p1252_p2 = pnand %p1251_p1, %p1245_p0 }
  0x4b   : > { %1255 = shalt.err (!%p1252_p2)
}
  0x4c   : > { %1104 = dma.hbm_to_vmem [thread:$0]  (!%p1507_p13), %s1501_s14, 128, %s1503_s21, %s212_s28  }
  0x4d   : > { %p1715_p7 = scmp.ne.s32.totalorder %s1709_s27, 0 }
  0x4e   : > { %s1539_s6 = sand.u32 (!%p1715_p7), 1, %s1326_s16   ;;  %p1716_p3 = scmp.ne.s32.totalorder (!%p1715_p7), %s1707_s25, 0 }
  0x4f   : > { %231 = sbr.rel (%p1715_p7) target bundleno = 1207 (0x4b7), region = 36  ;;  %s991_s9 = sshll.u32 (!%p1715_p7), %s1539_s6, 3 }
  0x50   : > { %s234_s11 = scalar_lea.sflag (!%p1715_p7), [#allocation3], %s1539_s6  ;;  %s237_s7 = scalar_lea.vmem (!%p1715_p7), [#allocation2], %s991_s9 }
  0x56   : > { %1309 = dma.done.wait (%p1716_p3), %s234_s11, 128  }
  0x57   : > { %1311 = vsyncadd (%p1716_p3), %s234_s11, 4294967168  ;;  %p1717_p13 = scmp.ne.s32.totalorder %s1705_s23, 0 }
  0x59   : > { %1313 = dma.done.wait (%p1717_p13), [#allocation6], 256  }
  0x5a   : > { %1315 = vsyncadd (%p1717_p13), [#allocation6], 4294967040  ;;  %v1348_v0 = vmov 0.0   ;;  %vm1349_vm0 = vmmov 0   ;;  %v1180_v1 = vld [vmem:[#allocation5] sm:$0xff]   ;;  %v1181_v2 = vld [vmem:[#allocation5 + $0x8] sm:$0xff]  }
  0x5b   : > { %1033 = vmatprep.subr.bf16.mxu0 %v1348_v0  ;;  %1037 = vmatprep.mubr.msk.bf16.mxu0 %vm1349_vm0, %v1348_v0  ;;  %v279_v3 = vld [vmem:[%s237_s7] sm:$0xff]  ;;  %vm297_vm1 = vcmask 261120   ;;  %s1350_s27 = smov 96   ;;  %s1351_s14 = smov 88   ;;  %vm355_vm2 = vcmask 64512   ;;  %vm417_vm3 = vcmask 1043456  }
  0x5c   : > { %1041 = vmatprep.subr.bf16.mxu1 %v1348_v0  ;;  %1043 = vmatprep.mubr.msk.bf16.mxu1 %vm1349_vm0, %v1348_v0  ;;  %v280_v4 = vpack.c.bf16 %v279_v3, %v279_v3  ;;  %v997_v5 = vld [vmem:[%s1698_s2] ss:$0 sm:$0xff]  ;;  %s1352_s21 = smov 120   ;;  %s1353_s22 = smov 112   ;;  %vm597_vm4 = vcmask 130112   ;;  %vm723_vm5 = vcmask 195712  }
  0x5d   : > { %1034 = vmatpush3.bf16.msra.mxu0 %v1180_v1  ;;  %s1354_s28 = smov 80   ;;  %s1355_s12 = smov 104   ;;  %v1603_v45 = vld [vmem:[%s1699_s3] ss:$0 sm:$0xff]  ;;  %vm849_vm6 = vcmask 261312  }
  0x5e   : > { %1035 = vmatprep.subr.bf16.mxu0 %v1348_v0  ;;  %s1356_s29 = smov 72   ;;  %s1357_s13 = smov 56  }
  0x5f   : > { %s1358_s24 = smov 64   ;;  %s1359_s30 = smov 40  }
  0x60   : > { %s1360_s11 = smov 48   ;;  %s1635_s25 = scalar_lea.vmem [#allocation7], %s991_s9 }
  0x61   : > { %1036 = vmatpush3.bf16.msra.mxu0 %v1181_v2  ;;  %s1362_s9 = smov 16  }
  0x62   : > { %1047 = vmatprep.subr.bf16.mxu0 %v1348_v0 }
  0x64   : > { %1038 = vmatmul.mubr.msk.bf16.vlgmr.msra.gmra.mrb[0].mxu0 %vm297_vm1, %v280_v4 }
  0x65   : > { %1049 = vmatprep.mubr.msk.bf16.mxu0 %vm1349_vm0, %v1348_v0 }
 0x137   : > { %v335_v6 = vpop.f32.mrb[0].mxu0 }
 0x138   : > { %v348_v7 = vadd.f32 %v997_v5, %v335_v6  ;;  %v1566_v8 = vpack.c.bf16 %v335_v6, %v335_v6  ;;  %v1039_v9 = vpop.f32.mrb[1].mxu0 }
 0x139   : > { %v338_v10 = vpop.f32.mrb[2].mxu0 }
 0x13a   : > { %v349_v11 = vmul.f32 0.35355338, %v348_v7  ;;  %353 = vrot.lane.b32.xlu0 %v1566_v8, %s1350_s27  ;;  %v1040_v12 = vpop.f32.mrb[3].mxu0  ;;  %s1361_s27 = smov 8  }
 0x13c   : > { %v350_v13 = vpack.c.bf16 %v349_v11, %v349_v11 }
 0x13e   : > { %475 = vrot.lane.b32.xlu0 %v1566_v8, %s1351_s14  ;;  %473 = vrot.lane.b32.xlu1 %v350_v13, %s1352_s21  ;;  %s1363_s14 = smov 24  }
 0x142   : > { %599 = vrot.lane.b32.xlu0 %v350_v13, %s1353_s22  ;;  %601 = vrot.lane.b32.xlu1 %v1566_v8, %s1354_s28 }
 0x146   : > { %725 = vrot.lane.b32.xlu0 %v350_v13, %s1355_s12  ;;  %727 = vrot.lane.b32.xlu1 %v1566_v8, %s1356_s29 }
 0x1ac   : > { %v354_v14 = vpop.permute.xlu0 %353 }
 0x1ad   : > { %v360_v15 = vsel %vm355_vm2, %v354_v14, 0 }
 0x1ae   : > { %1042 = vmatpush3.bf16.xpose.msra.mxu1 %v360_v15 }
 0x1af   : > { %1053 = vmatprep.subr.bf16.mxu1 %v1348_v0 }
 0x1b0   : > { %v476_v16 = vpop.permute.xlu0 %475  ;;  %v474_v17 = vpop.permute.xlu1 %473 }
 0x1b1   : > { %v481_v18 = vsel %vm355_vm2, %v476_v16, 0 }
 0x1b4   : > { %v602_v19 = vpop.permute.xlu1 %601  ;;  %v600_v22 = vpop.permute.xlu0 %599 }
 0x1b5   : > { %1044 = vmatmul.mubr.msk.bf16.vlgmr.msra.gmra.mrb[0].mxu1 %vm355_vm2, %v350_v13  ;;  %v607_v20 = vsel %vm355_vm2, %v602_v19, 0 }
 0x1b6   : > { %1054 = vmatpush3.bf16.xpose.msra.mxu1 %v481_v18  ;;  %1055 = vmatprep.mubr.msk.bf16.mxu1 %vm1349_vm0, %v1348_v0 }
 0x1b7   : > { %1065 = vmatprep.subr.bf16.mxu1 %v1348_v0 }
 0x1b8   : > { %v728_v21 = vpop.permute.xlu1 %727  ;;  %v726_v24 = vpop.permute.xlu0 %725 }
 0x1b9   : > { %v733_v23 = vsel %vm355_vm2, %v728_v21, 0 }
 0x1bd   : > { %1056 = vmatmul.mubr.msk.bf16.vlgmr.msra.gmra.mrb[4].mxu1 %vm355_vm2, %v474_v17 }
 0x1be   : > { %1066 = vmatpush3.bf16.xpose.msra.mxu1 %v607_v20  ;;  %1067 = vmatprep.mubr.msk.bf16.mxu1 %vm1349_vm0, %v1348_v0 }
 0x1bf   : > { %1077 = vmatprep.subr.bf16.mxu1 %v1348_v0 }
 0x1c5   : > { %1068 = vmatmul.mubr.msk.bf16.vlgmr.msra.gmra.mrb[8].mxu1 %vm355_vm2, %v600_v22 }
 0x1c6   : > { %1078 = vmatpush3.bf16.xpose.msra.mxu1 %v733_v23  ;;  %1079 = vmatprep.mubr.msk.bf16.mxu1 %vm1349_vm0, %v1348_v0 }
 0x1cd   : > { %1080 = vmatmul.mubr.msk.bf16.vlgmr.msra.gmra.mrb[12].mxu1 %vm355_vm2, %v726_v24 }
 0x288   : > { %v396_v25 = vpop.f32.mrb[0].mxu1 }
 0x289   : > { %v1045_v26 = vpop.f32.mrb[1].mxu1  ;;  %v402_v27 = vsel %vm355_vm2, %v396_v25, -inf }
 0x28a   : > { %403 = vmax.xlane.f32.xlu1 %v402_v27  ;;  %v399_v28 = vpop.f32.mrb[2].mxu1 }
 0x28b   : > { %v1046_v29 = vpop.f32.mrb[3].mxu1 }
 0x290   : > { %v517_v30 = vpop.f32.mrb[4].mxu1 }
 0x291   : > { %v1057_v31 = vpop.f32.mrb[5].mxu1  ;;  %v523_v32 = vsel %vm355_vm2, %v517_v30, -inf }
 0x292   : > { %524 = vmax.xlane.f32.xlu0 %v523_v32  ;;  %v520_v33 = vpop.f32.mrb[6].mxu1 }
 0x293   : > { %v1058_v34 = vpop.f32.mrb[7].mxu1 }
 0x298   : > { %v643_v35 = vpop.f32.mrb[8].mxu1 }
 0x299   : > { %v1069_v36 = vpop.f32.mrb[9].mxu1  ;;  %v649_v37 = vsel %vm355_vm2, %v643_v35, -inf }
 0x29a   : > { %650 = vmax.xlane.f32.xlu0 %v649_v37  ;;  %v646_v38 = vpop.f32.mrb[10].mxu1 }
 0x29b   : > { %533 = vrot.lane.b32.xlu1 %v1566_v8, %s1357_s13  ;;  %v1070_v39 = vpop.f32.mrb[11].mxu1  ;;  %s852_s13 = scalar_lea.sflag [#allocation4], %s1539_s6 }
 0x2a0   : > { %v769_v40 = vpop.f32.mrb[12].mxu1 }
 0x2a1   : > { %v1081_v41 = vpop.f32.mrb[13].mxu1  ;;  %v775_v44 = vsel %vm355_vm2, %v769_v40, -inf }
 0x2a2   : > { %v772_v42 = vpop.f32.mrb[14].mxu1 }
 0x2a3   : > { %v1082_v43 = vpop.f32.mrb[15].mxu1 }
 0x2b0   : > { %412 = vrot.lane.b32.xlu0 %v1566_v8, %s1358_s24 }
 0x2b4   : > { %785 = vrot.lane.b32.xlu0 %v1566_v8, %s1359_s30 }
 0x2bf   : > { %776 = vmax.xlane.f32.xlu1 %v775_v44 }
 0x2d0   : > { %659 = vrot.lane.b32.xlu1 %v1566_v8, %s1360_s11 }
 0x2d4   : > { %589 = vrot.lane.b32.xlu1 %v1603_v45, %s1352_s21  ;;  %s1011_s21 = sshll.u32 %s1334_s18, 7  ;;  %s1364_s18 = smov [#allocation7]  }
 0x2d5   : > { %s1646_s29 = scalar_lea.hbm %s1700_s4, %s1011_s21  ;;  %s1260_s30 = sshll.u32 %s1364_s18, 4  ;;  %s1261_s30 = int_to_ptr.vmem [resolvable:$false] %s1260_s30 }
 0x2d6   : > { %s1262_s11 = scalar_lea.vmem %s1261_s30, 256 }
 0x317   : > { %v404_v46 = vpop.xlane.xlu1 %403 }
 0x318   : > { %v405_v47 = vsub.f32 %v396_v25, %v404_v46 }
 0x31a   : > { %v406_v48 = vmul.f32 1.442695, %v405_v47 }
 0x31b   : > { %v534_v58 = vpop.permute.xlu1 %533 }
 0x31c   : > { %1182 = vpow2.f32 %v406_v48  ;;  %v539_v62 = vsel %vm417_vm3, %v534_v58, 0 }
 0x31f   : > { %v525_v49 = vpop.xlane.xlu0 %524 }
 0x320   : > { %v526_v50 = vsub.f32 %v517_v30, %v525_v49 }
 0x322   : > { %v527_v51 = vmul.f32 1.442695, %v526_v50 }
 0x324   : > { %1184 = vpow2.f32 %v527_v51 }
 0x326   : > { %v1183_v55 = vpop.eup %1182 }
 0x327   : > { %v651_v52 = vpop.xlane.xlu0 %650  ;;  %v411_v60 = vpack.c.bf16 %v1183_v55, %v1183_v55  ;;  %v408_v14 = vsel %vm355_vm2, %v1183_v55, 0.0 }
 0x328   : > { %v652_v53 = vsub.f32 %v643_v35, %v651_v52 }
 0x32a   : > { %v653_v54 = vmul.f32 1.442695, %v652_v53 }
 0x32b   : > { %v413_v56 = vpop.permute.xlu0 %412 }
 0x32c   : > { %1186 = vpow2.f32 %v653_v54  ;;  %v419_v57 = vsel %vm417_vm3, %v413_v56, 0 }
 0x32d   : > { %1048 = vmatpush3.bf16.msra.mxu0 %v419_v57 }
 0x32e   : > { %v1185_v59 = vpop.eup %1184  ;;  %1059 = vmatprep.subr.bf16.mxu0 %v1348_v0 }
 0x32f   : > { %v529_v61 = vsel %vm355_vm2, %v1185_v59, 0.0  ;;  %v532_v1 = vpack.c.bf16 %v1185_v59, %v1185_v59  ;;  %v786_v8 = vpop.permute.xlu0 %785 }
 0x330   : > { %1050 = vmatmul.mubr.msk.bf16.vlgmr.msra.gmra.mrb[4].mxu0 %vm355_vm2, %v411_v60  ;;  %530 = vadd.xlane.f32.xlu1 %v529_v61  ;;  %v791_v10 = vsel %vm417_vm3, %v786_v8, 0 }
 0x331   : > { %1060 = vmatpush3.bf16.msra.mxu0 %v539_v62  ;;  %1061 = vmatprep.mubr.msk.bf16.mxu0 %vm1349_vm0, %v1348_v0 }
 0x332   : > { %1071 = vmatprep.subr.bf16.mxu0 %v1348_v0 }
 0x336   : > { %v1187_v63 = vpop.eup %1186 }
 0x337   : > { %v655_v2 = vsel %vm355_vm2, %v1187_v63, 0.0  ;;  %v658_v9 = vpack.c.bf16 %v1187_v63, %v1187_v63 }
 0x338   : > { %656 = vadd.xlane.f32.xlu0 %v655_v2  ;;  %1062 = vmatmul.mubr.msk.bf16.vlgmr.msra.gmra.mrb[8].mxu0 %vm355_vm2, %v532_v1 }
 0x339   : > { %1073 = vmatprep.mubr.msk.bf16.mxu0 %vm1349_vm0, %v1348_v0 }
 0x341   : > { %841 = vrot.lane.b32.xlu1 %v1603_v45, %s1355_s12 }
 0x34c   : > { %v777_v3 = vpop.xlane.xlu1 %776 }
 0x34d   : > { %v778_v4 = vsub.f32 %v769_v40, %v777_v3 }
 0x34f   : > { %v779_v5 = vmul.f32 1.442695, %v778_v4 }
 0x350   : > { %v660_v6 = vpop.permute.xlu1 %659 }
 0x351   : > { %1188 = vpow2.f32 %v779_v5  ;;  %v665_v7 = vsel %vm417_vm3, %v660_v6, 0 }
 0x352   : > { %1072 = vmatpush3.bf16.msra.mxu0 %v665_v7 }
 0x353   : > { %1083 = vmatprep.subr.bf16.mxu0 %v1348_v0 }
 0x354   : > { %v590_v15 = vpop.permute.xlu1 %589 }
 0x355   : > { %1074 = vmatmul.mubr.msk.bf16.vlgmr.msra.gmra.mrb[12].mxu0 %vm355_vm2, %v658_v9 }
 0x356   : > { %1084 = vmatpush3.bf16.msra.mxu0 %v791_v10  ;;  %1085 = vmatprep.mubr.msk.bf16.mxu0 %vm1349_vm0, %v1348_v0 }
 0x35b   : > { %v1189_v11 = vpop.eup %1188 }
 0x35c   : > { %v781_v12 = vsel %vm355_vm2, %v1189_v11, 0.0  ;;  %v784_v13 = vpack.c.bf16 %v1189_v11, %v1189_v11 }
 0x35d   : > { %782 = vadd.xlane.f32.xlu0 %v781_v12 }
 0x35e   : > { %1086 = vmatmul.mubr.msk.bf16.vlgmr.msra.gmra.mrb[16].mxu0 %vm355_vm2, %v784_v13 }
 0x365   : > { %409 = vadd.xlane.f32.xlu1 %v408_v14 }
 0x373   : > { %715 = vrot.lane.b32.xlu0 %v1603_v45, %s1353_s22  ;;  %s866_s22 = sshll.u32 %s1635_s25, 4  ;;  %s1648_s22 = int_to_ptr.vmem [resolvable:$true] %s866_s22 }
 0x374   : > { %s1256_s24 = scalar_lea.vmem %s1648_s22, 128  ;;  %p1263_p12 = scmp.lt.s32.totalorder %s1648_s22, %s1261_s30 }
 0x375   : > { %p1257_p4 = scmp.ne.s32.totalorder %s1648_s22, %s1256_s24  ;;  %p1264_p11 = scmp.lt.s32.totalorder %s1262_s11, %s1256_s24 }
 0x377   : > { %p1258_p6 = pnand %p1257_p4, %p1486_p10  ;;  %p1265_p0 = por %p1264_p11, %p1263_p12 }
 0x379   : > { %p1259_p8 = pneg %p1258_p6 }
 0x37b   : > { %p1266_p5 = pnand %p1265_p0, %p1259_p8 }
 0x3bd   : > { %v531_v16 = vpop.xlane.xlu1 %530 }
 0x3c1   : > { %v842_v17 = vpop.permute.xlu1 %841 }
 0x3c5   : > { %v657_v32 = vpop.xlane.xlu0 %656 }
 0x3ea   : > { %v783_v33 = vpop.xlane.xlu0 %782 }
 0x3ee   : > { %v716_v36 = vpop.permute.xlu0 %715 }
 0x3f2   : > { %v410_v18 = vpop.xlane.xlu1 %409 }
 0x3f3   : > { %1190 = vrcp.f32 %v410_v18 }
 0x3f4   : > { %1192 = vrcp.f32 %v531_v16 }
 0x3f5   : > { %1194 = vrcp.f32 %v657_v32 }
 0x3f6   : > { %1196 = vrcp.f32 %v783_v33 }
 0x3fd   : > { %v1191_v0 = vpop.eup %1190 }
 0x3fe   : > { %v1193_v25 = vpop.eup %1192 }
 0x3ff   : > { %v1195_v34 = vpop.eup %1194 }
 0x400   : > { %v1197_v42 = vpop.eup %1196 }
 0x403   : > { %v455_v19 = vpop.f32.mrb[4].mxu0 }
 0x404   : > { %v462_v20 = vmul.f32 %v1191_v0, %v455_v19  ;;  %v1051_v21 = vpop.f32.mrb[5].mxu0 }
 0x405   : > { %v458_v22 = vpop.f32.mrb[6].mxu0 }
 0x406   : > { %v470_v23 = vadd.f32 %v1603_v45, %v462_v20  ;;  %v1052_v24 = vpop.f32.mrb[7].mxu0 }
 0x408   : > { %471 = vst.msk [vmem:[%s1635_s25] sm:$0xff] %vm355_vm2, %v470_v23 }
 0x40b   : > { %v575_v26 = vpop.f32.mrb[8].mxu0 }
 0x40c   : > { %v582_v27 = vmul.f32 %v1193_v25, %v575_v26  ;;  %v1063_v28 = vpop.f32.mrb[9].mxu0 }
 0x40d   : > { %v578_v29 = vpop.f32.mrb[10].mxu0 }
 0x40e   : > { %v592_v30 = vadd.f32 %v590_v15, %v582_v27  ;;  %v1064_v31 = vpop.f32.mrb[11].mxu0 }
 0x410   : > { %594 = vrot.lane.b32.xlu0 %v592_v30, %s1361_s27 }
 0x428   : > { %v701_v35 = vpop.f32.mrb[12].mxu0 }
 0x429   : > { %v708_v37 = vmul.f32 %v1195_v34, %v701_v35  ;;  %v1075_v38 = vpop.f32.mrb[13].mxu0 }
 0x42a   : > { %v704_v39 = vpop.f32.mrb[14].mxu0 }
 0x42b   : > { %v718_v40 = vadd.f32 %v716_v36, %v708_v37  ;;  %v1076_v41 = vpop.f32.mrb[15].mxu0 }
 0x42d   : > { %720 = vrot.lane.b32.xlu0 %v718_v40, %s1362_s9 }
 0x431   : > { %v827_v43 = vpop.f32.mrb[16].mxu0 }
 0x432   : > { %v834_v44 = vmul.f32 %v1197_v42, %v827_v43  ;;  %v1087_v45 = vpop.f32.mrb[17].mxu0 }
 0x433   : > { %v830_v46 = vpop.f32.mrb[18].mxu0 }
 0x434   : > { %v844_v47 = vadd.f32 %v842_v17, %v834_v44  ;;  %v1088_v48 = vpop.f32.mrb[19].mxu0 }
 0x436   : > { %846 = vrot.lane.b32.xlu0 %v844_v47, %s1363_s14 }
 0x482   : > { %v595_v49 = vpop.permute.xlu0 %594 }
 0x483   : > { %598 = vst.msk [vmem:[%s1635_s25] sm:$0xff] %vm597_vm4, %v595_v49 }
 0x49f   : > { %v721_v50 = vpop.permute.xlu0 %720 }
 0x4a0   : > { %724 = vst.msk [vmem:[%s1635_s25] sm:$0xff] %vm723_vm5, %v721_v50 }
 0x4a8   : > { %v847_v51 = vpop.permute.xlu0 %846 }
 0x4a9   : > { %850 = vst.msk [vmem:[%s1635_s25] sm:$0xff] %vm849_vm6, %v847_v51 }
 0x4aa   : > { %1269 = shalt.err (!%p1266_p5)
}
 0x4ab   : > { %s1270_s6 = scalar_lea.hbm %s1646_s29, 128  ;;  %s1274_s25 = scalar_lea.hbm %s1700_s4, 256 }
 0x4ac   : > { %p1271_p9 = scmp.ne.s32.totalorder %s1646_s29, %s1270_s6  ;;  %p1275_p7 = scmp.lt.u32.totalorder %s1646_s29, %s1700_s4 }
 0x4ad   : > { %p1276_p3 = scmp.lt.u32.totalorder %s1274_s25, %s1270_s6  ;;  %p1278_p4 = scmp.lt.u32.totalorder %s1270_s6, %s1646_s29 }
 0x4ae   : > { %p1272_p1 = pnand %p1271_p9, %p1486_p10 }
 0x4af   : > { %p1277_p13 = por %p1276_p3, %p1275_p7 }
 0x4b0   : > { %p1273_p2 = pneg %p1272_p1 }
 0x4b1   : > { %p1279_p6 = por %p1278_p4, %p1277_p13 }
 0x4b3   : > { %p1280_p8 = pnand %p1279_p6, %p1273_p2 }
 0x4b5   : > { %1283 = shalt.err (!%p1280_p8)
}
 0x4b6   : > { %1095 = dma.vmem_to_hbm [thread:$0]  (%p1486_p10), %s1648_s22, 128, %s1646_s29, %s852_s13  }
 0x4b7 PF: > { %s878_s14 = sand.u32 1, %s1322_s15   ;;  %p1718_p12 = scmp.ne.s32.totalorder %s1708_s26, 0 }
 0x4b8   : > { %p1719_p11 = scmp.ge.s32.totalorder %s1342_s20, 2  ;;  %s879_s21 = scalar_lea.sflag [#allocation4], %s878_s14 }
 0x4ba   : > { %p1106_p0 = pnand %p1719_p11, %p1718_p12 }
 0x4bc   : > { %1317 = dma.done.wait (!%p1106_p0), %s879_s21, 128  }
 0x4bd   : > { %1319 = vsyncadd (!%p1106_p0), %s879_s21, 4294967168  ;;  %s21_s20 = sadd.s32 1, %s1342_s20   ;;  %s1720_s15 = smov %s1326_s16 }
 0x4be   : > { %p18_p5 = scmp.ge.s32.totalorder %s21_s20, 4   ;;  %s1721_s16 = smov %s1330_s17 }
 0x4bf   : > { %s1722_s17 = smov %s1495_s10  ;;  %s1723_s18 = smov %s1338_s19 }
 0x4c0   : > { %s1724_s19 = smov %s1726_s5  ;;  %20 = sbr.rel (!%p18_p5) target bundleno = 7 (0x7), region = 92 }
 0x4c7   :  { %884 = vsyncpa [#allocation3], 1 }
 0x4c8   :  { %886 = vsyncpa [#allocation3 + $0x1], 1 }
 0x4c9   :  { %887 = vsyncpa [#allocation6], 1 }
 0x4ca   :  { %888 = vsyncpa [#allocation4], 1 }
 0x4cb   :  { %890 = vsyncpa [#allocation4 + $0x1], 1 }

</bundles_post_ra>
